<compile_context>
chip_gen: v5e
topology: v5e:2x2
jax: 0.10.0
libtpu: 0.0.40
codegen_flags: <defaults>
</compile_context>

<pallas_src>
import functools

import numpy as np
import jax
import jax.numpy as jnp
from jax import lax
from jax.experimental import pallas as pl
from jax.experimental.pallas import tpu as pltpu

_LANES = 128
_SUBLANES = 8
_ALIGN = _LANES * _SUBLANES  # 1024 f32 elements == one vreg


def _falling_ode_kernel(x_ref, f_ref, *, w_over_m, k_over_m):
    # x_ref / f_ref: VMEM (TR, 128) lane-dense views of the flattened state,
    # interleaved [y0, y1, y0, y1, ...] along lanes.
    x = x_ref[...]
    # Bring each sample's y1 (odd lane) onto its preceding even lane.
    # np.roll semantics: shift = 127 == -1 (mod 128)  =>  result[j] = x[j+1].
    y1_on_even = pltpu.roll(x, shift=_LANES - 1, axis=1)

    lane = lax.broadcasted_iota(jnp.int32, x.shape, 1)
    is_even = (lane % 2) == 0
    # even lanes: f[..., 0] = y1
    # odd  lanes: f[..., 1] = w/m - (k/m) * y1  (y1 already sits on odd lanes)
    f_ref[...] = jnp.where(is_even, y1_on_even, w_over_m - k_over_m * x)


def _f_plain_jnp(y, w_over_m, k_over_m):
    f0 = y[..., 1]
    f1 = w_over_m - k_over_m * y[..., 1]
    return jnp.stack([f0, f1], axis=-1)


def falling_ode_forward(t, y, m, w, k, *, block_rows=4096, use_pallas=None):
    """Pallas implementation of FallingODE.forward(t, y) -> (f, df).

    t is accepted for API parity but (as in the PyTorch module) unused.
    m, w, k must be static Python scalars.
    """
    del t  # unused by the ODE right-hand side
    y = jnp.asarray(y, jnp.float32)
    assert y.shape[-1] == 2, "state dimension must be 2"
    lead = y.shape[:-1]
    n = int(np.prod(lead, dtype=np.int64)) * 2 if lead else 2

    w_over_m = float(w) / float(m)
    k_over_m = float(k) / float(m)

    if use_pallas is None:
        # Pallas pays off only for large batched states; tiny inputs are
        # strictly faster as one fused XLA elementwise op.
        use_pallas = n * 4 >= (1 << 20)

    if use_pallas:
        # --- lane-dense (rows, 128) view of the interleaved flat buffer ---
        flat = y.reshape(-1)
        n_padded = -(-n // _ALIGN) * _ALIGN            # next multiple of 1024
        pad = n_padded - n
        if pad:
            flat = jnp.pad(flat, (0, pad))
        rows = n_padded // _LANES                      # multiple of 8
        x2d = flat.reshape(rows, _LANES)

        # Tile: as large as allowed, but cap at ceil(rows/2) (sublane-aligned)
        # for large inputs so the grid has >= 2 parallel steps (v7x has 2 TCs).
        if rows > _SUBLANES:
            half = ((-(-rows // 2) + _SUBLANES - 1) // _SUBLANES) * _SUBLANES
            tr = min(block_rows, half)
        else:
            tr = rows
        grid = -(-rows // tr)                          # ragged last block OK

        kernel = functools.partial(
            _falling_ode_kernel, w_over_m=w_over_m, k_over_m=k_over_m)

        f2d = pl.pallas_call(
            kernel,
            out_shape=jax.ShapeDtypeStruct((rows, _LANES), jnp.float32),
            grid=(grid,),
            in_specs=[pl.BlockSpec((tr, _LANES), lambda i: (i, 0))],
            out_specs=pl.BlockSpec((tr, _LANES), lambda i: (i, 0)),
            compiler_params=pltpu.CompilerParams(
                dimension_semantics=("parallel",)),
        )(x2d)

        if pad:
            f = f2d.reshape(-1)[:n].reshape(*lead, 2)
        else:
            f = f2d.reshape(*lead, 2)
    else:
        f = _f_plain_jnp(y, w_over_m, k_over_m)

    # df does not depend on y: (2,2) constant, broadcast lazily in the wrapper.
    df_base = jnp.array([[0.0, 1.0], [0.0, -k_over_m]], dtype=jnp.float32)
    df = jnp.broadcast_to(df_base, (*lead, 2, 2))
    return f, df


if __name__ == "__main__":
    # Parameters from the docstring: m = 0.25, w = 8.0, k = 2.0
    M, W, K = 0.25, 8.0, 2.0

    def check(y, f, df):
        y_np = np.asarray(y)
        f_ref = np.empty_like(y_np)
        f_ref[..., 0] = y_np[..., 1]
        f_ref[..., 1] = (W - K * y_np[..., 1]) / M
        df_ref = np.zeros(y_np.shape + (2,), dtype=np.float32)
        df_ref[..., 0, 1] = 1.0
        df_ref[..., 1, 1] = -K / M
        assert np.asarray(f).shape == y_np.shape
        assert np.asarray(df).shape == y_np.shape + (2,)
        np.testing.assert_allclose(np.asarray(f), f_ref, rtol=1e-6, atol=1e-6)
        np.testing.assert_allclose(np.asarray(df), df_ref, rtol=1e-6, atol=1e-6)

    key = jax.random.PRNGKey(0)
    # Shapes exercise: padded single-block, unpadded (aligned) single-block,
    # and the multi-block / tr-capped path (grid = 2).
    for shp in [(8, 2), (2, 5, 2), (512, 2), (8192, 2)]:
        key, sub = jax.random.split(key)
        y = jax.random.normal(sub, shp, dtype=jnp.float32)
        t = jnp.zeros(shp[:-1], dtype=jnp.float32)

        f, df = falling_ode_forward(t, y, M, W, K, use_pallas=True)
        f = jax.block_until_ready(f)
        df = jax.block_until_ready(df)
        check(y, f, df)

    # Also sanity-check the small-input (plain-jnp) auto-dispatch path once.
    key, sub = jax.random.split(key)
    y_small = jax.random.normal(sub, (8, 2), dtype=jnp.float32)
    f_s, df_s = falling_ode_forward(None, y_small, M, W, K)  # auto -> jnp path
    check(y_small, jax.block_until_ready(f_s), jax.block_until_ready(df_s))

    print("KERNEL_OK")
</pallas_src>

<mosaic_0001>
module attributes {stable_mosaic.version = 11 : i64} {
  func.func @_falling_ode_kernel(%arg0: i32, %arg1: memref<8x128xf32, #tpu.memory_space<vmem>>, %arg2: memref<8x128xf32, #tpu.memory_space<vmem>>) attributes {dimension_semantics = [#tpu.dimension_semantics<parallel>], iteration_bounds = array<i64: 1>, scalar_prefetch = 0 : i64, scratch_operands = 0 : i64, tpu.core_type = #tpu.core_type<tc>, window_params = [{transform_indices = @transform_0, window_bounds = array<i64: 8, 128>}, {transform_indices = @transform_1, window_bounds = array<i64: 8, 128>}]} {
    %c0 = arith.constant 0 : index
    %c0_0 = arith.constant 0 : index
    %0 = vector.load %arg1[%c0, %c0_0] : memref<8x128xf32, #tpu.memory_space<vmem>>, vector<8x128xf32>
    %c127_i32 = arith.constant 127 : i32
    %1 = tpu.dynamic_rotate %0 by %c127_i32 dim 1 : vector<8x128xf32>, i32 -> vector<8x128xf32>
    %2 = tpu.iota {dimensions = array<i32: 1>} : vector<8x128xi32>
    %c2_i32 = arith.constant 2 : i32
    %c0_i32 = arith.constant 0 : i32
    %3 = arith.cmpi eq, %c2_i32, %c0_i32 : i32
    %c1_i32 = arith.constant 1 : i32
    %4 = arith.select %3, %c1_i32, %c2_i32 : i32
    %5 = vector.broadcast %4 : i32 to vector<8x128xi32>
    %6 = arith.remsi %2, %5 : vector<8x128xi32>
    %c0_i32_1 = arith.constant 0 : i32
    %7 = vector.broadcast %c0_i32_1 : i32 to vector<8x128xi32>
    %8 = arith.cmpi ne, %6, %7 : vector<8x128xi32>
    %c0_i32_2 = arith.constant 0 : i32
    %9 = vector.broadcast %c0_i32_2 : i32 to vector<8x128xi32>
    %10 = arith.cmpi slt, %6, %9 : vector<8x128xi32>
    %c0_i32_3 = arith.constant 0 : i32
    %11 = arith.cmpi slt, %4, %c0_i32_3 : i32
    %12 = vector.broadcast %11 : i1 to vector<8x128xi1>
    %13 = vector.broadcast %12 : vector<8x128xi1> to vector<8x128xi1>
    %14 = arith.xori %10, %13 : vector<8x128xi1>
    %15 = arith.andi %14, %8 : vector<8x128xi1>
    %16 = vector.broadcast %4 : i32 to vector<8x128xi32>
    %17 = arith.addi %6, %16 : vector<8x128xi32>
    %18 = arith.select %15, %17, %6 : vector<8x128xi1>, vector<8x128xi32>
    %c0_i32_4 = arith.constant 0 : i32
    %19 = vector.broadcast %c0_i32_4 : i32 to vector<8x128xi32>
    %20 = arith.cmpi eq, %18, %19 : vector<8x128xi32>
    %cst = arith.constant 8.000000e+00 : f32
    %21 = vector.broadcast %cst : f32 to vector<8x128xf32>
    %22 = arith.mulf %21, %0 : vector<8x128xf32>
    %cst_5 = arith.constant 3.200000e+01 : f32
    %23 = vector.broadcast %cst_5 : f32 to vector<8x128xf32>
    %24 = arith.subf %23, %22 : vector<8x128xf32>
    %25 = arith.select %20, %1, %24 : vector<8x128xi1>, vector<8x128xf32>
    %c0_6 = arith.constant 0 : index
    %c0_7 = arith.constant 0 : index
    %26 = vector.load %arg2[%c0_6, %c0_7] : memref<8x128xf32, #tpu.memory_space<vmem>>, vector<8x128xf32>
    tpu.vector_store %arg2[%c0_6, %c0_7], %25 {strides = array<i32>} : memref<8x128xf32, #tpu.memory_space<vmem>>, vector<8x128xf32>,
    return
  }
  func.func @transform_0(%arg0: i32) -> (i32, i32) {
    %c0_i32 = arith.constant 0 : i32
    %c0_i32_0 = arith.constant 0 : i32
    return %arg0, %c0_i32 : i32, i32
  }
  func.func @transform_1(%arg0: i32) -> (i32, i32) {
    %c0_i32 = arith.constant 0 : i32
    %c0_i32_0 = arith.constant 0 : i32
    return %arg0, %c0_i32 : i32, i32
  }
}

</mosaic_0001>

<bundles_post_ra>
// kernel: tpu_custom_call.1
= control target key start
LH: loop header
LB: loop body
LE: loop exit
PB: predicated region body
PF: predicated region fallthrough
CT: control target
= control target key end

     0   :  { %6 = vsyncpa [#allocation3], 0  ;;  %s136_s0 = inlined_call_operand.hbm [shape: f32[8,128], index: 0, kind: input, shape index: {}]   ;;  %s137_s1 = inlined_call_operand.hbm [shape: f32[8,128], index: 1, kind: output, shape index: {}]  }
   0x1   :  { %7 = vsyncpa [#allocation4], 0  ;;  %s13_s8 = sshll.u32 %s136_s0, 4  ;;  %s117_s9 = smov [#allocation2]   ;;  %s14_s8 = int_to_ptr.hbm [resolvable:$true] %s13_s8 }
   0x2   :  { %s15_s10 = sshll.u32 %s117_s9, 4  ;;  %s16_s10 = int_to_ptr.vmem [resolvable:$true] %s15_s10 }
   0x3   :  { %18 = dma.hbm_to_vmem [thread:$0]  %s14_s8, 128, %s16_s10, [#allocation3]  }
   0x4   :  { %113 = dma.done.wait [#allocation3], 128  }
   0x5   :  { %114 = vsyncadd [#allocation3], 4294967168  ;;  %v23_v0 = vld [vmem:[#allocation2] sm:$0xff]  ;;  %s118_s11 = smov 127   ;;  %v26_v1 = vlaneseq  ;;  %s119_s12 = smov [#allocation5]  }
   0x6   :  { %24 = vrot.lane.b32.xlu0 %v23_v0, %s118_s11  ;;  %v41_v3 = vmul.f32 8.0, %v23_v0  ;;  %s50_s13 = sshll.u32 %s119_s12, 4  ;;  %s52_s0 = sshll.u32 %s137_s1, 4  ;;  %s51_s13 = int_to_ptr.vmem [resolvable:$true] %s50_s13  ;;  %s53_s0 = int_to_ptr.hbm [resolvable:$true] %s52_s0 }
   0x7   :  { %v27_v2 = vand.u32 127, %v26_v1 }
   0x8   :  { %v42_v5 = vsub.f32 32.0, %v41_v3 }
   0x9   :  { %v32_v4 = vand.u32 1, %v27_v2 }
   0xb   :  { %vm40_vm0 = vcmp.eq.s32.totalorder %v32_v4, 0 }
  0x78   :  { %v25_v6 = vpop.permute.xlu0 %24 }
  0x79   :  { %v43_v7 = vsel %vm40_vm0, %v25_v6, %v42_v5 }
  0x7a   :  { %44 = vst [vmem:[#allocation5] sm:$0xff] %v43_v7 }
  0x7b   :  { %55 = dma.vmem_to_hbm [thread:$0]  %s51_s13, 128, %s53_s0, [#allocation4]  }
  0x7c   :  { %115 = dma.done.wait [#allocation4], 128  }
  0x7d   :  { %116 = vsyncadd [#allocation4], 4294967168 }
  0x7e   :  { %60 = vsyncpa [#allocation3], 1 }
  0x7f   :  { %61 = vsyncpa [#allocation4], 1 }

</bundles_post_ra>
